<compile_context>
chip_gen: v6e
topology: v6e:2x2x1
jax: 0.10.0
libtpu: 0.0.40
codegen_flags: <defaults>
</compile_context>

<pallas_src>
import jax
import jax.numpy as jnp
from jax.experimental import pallas as pl
from jax.experimental.pallas import tpu as pltpu


def _round_up(x: int, m: int) -> int:
    return ((x + m - 1) // m) * m


def _moc_head_kernel(w_ref, b_ref, x_ref, o_ref):
    # w_ref: (K, G)  VMEM, resident across the whole grid (constant index_map)
    # b_ref: (1,)    SMEM scalar bias (f32)
    # x_ref: (T, K)  VMEM row tile (K = G*H after the lane-fold)
    # o_ref: (T, G)  per-row logits for this tile
    y = jnp.dot(x_ref[...], w_ref[...], preferred_element_type=jnp.float32)  # MXU, f32 acc
    o_ref[...] = (y + b_ref[0]).astype(o_ref.dtype)


def _vmem_capacity_bytes() -> int:
    # Generation-aware budget (v5e/v6e: 128 MiB, v7x: 64 MiB per TC).
    # Fall back to the smallest (v7x) if the query is unavailable.
    try:
        return int(pltpu.get_tpu_info().vmem_capacity_bytes)
    except Exception:
        return 64 * 1024 * 1024


def moc_head(x, weight, bias, *, tile_rows=None):
    """x: [B, L, H]; weight: [1, H] (nn.Linear(hid_dim, 1).weight); bias: [1]."""
    B, L, H = x.shape
    R = B * L
    x_it = jnp.dtype(x.dtype).itemsize
    out_dtype = x.dtype

    # ---- lane-fold: pack G rows into the lane dimension when H is narrow ----
    G = 1
    if H < 128:
        for g in range(max(1, 128 // H), 0, -1):
            if R % g == 0:
                G = g
                break
    K = G * H
    rows = R // G
    xf = x.reshape(rows, K)            # contiguous reshape: free, no extra HBM copy

    # Weight: (1, H) -> (K, G) block-diagonal (identity fold) in x.dtype.
    w = weight.reshape(H).astype(x.dtype)
    if G > 1:
        w_mat = (jnp.eye(G, dtype=x.dtype)[:, None, :] * w[None, :, None]).reshape(K, G)
    else:
        w_mat = w.reshape(H, 1)
    b = bias.reshape(1).astype(jnp.float32)

    # ---- byte-budgeted, generation-aware tile size ---------------------------
    sub = max(8, 32 // x_it)                          # sublane multiple: 8/16/32 by dtype
    x_row = _round_up(K, 128) * x_it                  # lane-padded VMEM bytes per x row
    o_row = _round_up(G, 128) * jnp.dtype(out_dtype).itemsize
    w_blk = _round_up(K, sub) * 128 * x_it            # lane-padded weight block bytes

    vmem_phys = _vmem_capacity_bytes()
    x_block_cap = (16 if vmem_phys >= 96 * 1024 * 1024 else 8) * 1024 * 1024

    if tile_rows is None:
        tile_rows = max(sub, (x_block_cap // x_row) // sub * sub)
        # Keep >= ~4 grid steps on problems big enough to split so the
        # "parallel" axis can spread across v7x's two TensorCores, without
        # shrinking blocks below ~2 MiB (v5e/v6e lose nothing measurable).
        if rows * x_row >= 4 * (2 * 1024 * 1024):
            tile_rows = min(tile_rows, _round_up(pl.cdiv(rows, 4), sub))
    else:
        tile_rows = max(sub, (int(tile_rows) // sub) * sub)
    if tile_rows >= rows:
        tile_rows = rows                              # single full-extent block (always legal)

    num_tiles = pl.cdiv(rows, tile_rows)

    # Resident weight (constant block index).  Double-buffering it is pure VMEM
    # waste once it is large (big H), so single-buffer it then.
    if w_blk >= (1 << 20):
        w_spec = pl.BlockSpec((K, G), lambda i: (0, 0), pipeline_mode=pl.Buffered(1))
        w_bufs = 1
    else:
        w_spec = pl.BlockSpec((K, G), lambda i: (0, 0))
        w_bufs = 2

    # VMEM actually needed: double-buffered x + out blocks, weight, slack.
    need = 2 * tile_rows * (x_row + o_row) + w_bufs * w_blk + (2 << 20)
    vmem_limit = int(min(max(need, 32 * 1024 * 1024), vmem_phys - (4 << 20)))

    out = pl.pallas_call(
        _moc_head_kernel,
        out_shape=jax.ShapeDtypeStruct((rows, G), out_dtype),
        grid=(num_tiles,),
        in_specs=[
            w_spec,                                              # resident weight
            pl.BlockSpec(memory_space=pltpu.MemorySpace.SMEM),   # scalar bias
            pl.BlockSpec((tile_rows, K), lambda i: (i, 0)),      # x row tile
        ],
        out_specs=pl.BlockSpec((tile_rows, G), lambda i: (i, 0)),
        compiler_params=pltpu.CompilerParams(
            dimension_semantics=("parallel",),   # shard row tiles across TCs (v7x megacore)
            vmem_limit_bytes=vmem_limit,
        ),
    )(w_mat, b, xf)

    return out.reshape(B, L)


def moc_head_ref(x, weight, bias):
    # Pure-JAX reference matching nn.Linear(hid_dim, 1) + squeeze(-1).
    return (jnp.einsum("blh,oh->blo", x, weight) + bias).squeeze(-1)


if __name__ == "__main__":
    def make_case(key, B, L, H, dtype=jnp.float32):
        kx, kw, kb = jax.random.split(key, 3)
        bound = 1.0 / (H ** 0.5)
        xx = jax.random.normal(kx, (B, L, H), dtype=dtype)
        ww = jax.random.uniform(kw, (1, H), minval=-bound, maxval=bound, dtype=jnp.float32)
        bb = jax.random.uniform(kb, (1,), minval=-bound, maxval=bound, dtype=jnp.float32)
        return xx, ww, bb

    # Case 1: the module's natural small shape (batch=2, graph_len=8, hid_dim=32).
    # Exercises the lane-fold (G=4 -> K=128) with a single full-extent block.
    x1, w1, b1 = make_case(jax.random.PRNGKey(0), 2, 8, 32)
    out1 = jax.block_until_ready(moc_head(x1, w1, b1))
    ref1 = moc_head_ref(x1, w1, b1)
    assert out1.shape == (2, 8), out1.shape
    assert jnp.allclose(out1, ref1, atol=1e-2, rtol=1e-2), "mismatch (case 1)"

    # Case 2: H=96 does not divide 128 (no fold) + multi-tile grid with a ragged
    # last block (300 rows, 64-row tiles) -> verifies the pad-free masking path.
    x2, w2, b2 = make_case(jax.random.PRNGKey(1), 3, 100, 96)
    out2 = jax.block_until_ready(moc_head(x2, w2, b2, tile_rows=64))
    ref2 = moc_head_ref(x2, w2, b2)
    assert out2.shape == (3, 100), out2.shape
    assert jnp.allclose(out2, ref2, atol=1e-2, rtol=1e-2), "mismatch (case 2)"

    # Case 3: lane-fold (G=4) + multi-tile + ragged last block together.
    x3, w3, b3 = make_case(jax.random.PRNGKey(2), 2, 50, 32)
    out3 = jax.block_until_ready(moc_head(x3, w3, b3, tile_rows=8))
    ref3 = moc_head_ref(x3, w3, b3)
    assert out3.shape == (2, 50), out3.shape
    assert jnp.allclose(out3, ref3, atol=1e-2, rtol=1e-2), "mismatch (case 3)"

    print("KERNEL_OK")
</pallas_src>

<mosaic_0001>
module attributes {stable_mosaic.version = 11 : i64} {
  func.func @_moc_head_kernel(%arg0: i32, %arg1: memref<128x4xf32, #tpu.memory_space<vmem>>, %arg2: memref<1xf32, #tpu.memory_space<smem>>, %arg3: memref<4x128xf32, #tpu.memory_space<vmem>>, %arg4: memref<4x4xf32, #tpu.memory_space<vmem>>) attributes {dimension_semantics = [#tpu.dimension_semantics<parallel>], iteration_bounds = array<i64: 1>, scalar_prefetch = 0 : i64, scratch_operands = 0 : i64, tpu.core_type = #tpu.core_type<tc>, window_params = [{pipeline_mode = #tpu.pipeline_mode<synchronous>, transform_indices = @transform_0, window_bounds = array<i64: 128, 4>}, {transform_indices = @transform_1, window_bounds = array<i64: 1>}, {transform_indices = @transform_2, window_bounds = array<i64: 4, 128>}, {transform_indices = @transform_3, window_bounds = array<i64: 4, 4>}]} {
    %c0 = arith.constant 0 : index
    %c0_0 = arith.constant 0 : index
    %0 = vector.load %arg3[%c0, %c0_0] : memref<4x128xf32, #tpu.memory_space<vmem>>, vector<4x128xf32>
    %c0_1 = arith.constant 0 : index
    %c0_2 = arith.constant 0 : index
    %1 = vector.load %arg1[%c0_1, %c0_2] : memref<128x4xf32, #tpu.memory_space<vmem>>, vector<128x4xf32>
    %cst = arith.constant dense<0.000000e+00> : vector<4x4xf32>
    %2 = tpu.matmul %0, %1, %cst {dimension_numbers = #tpu.dot_dimension_numbers<[1], [0], [0], [1], [0, 0, 1, 1], [], []>} : vector<4x128xf32>, vector<128x4xf32>, vector<4x4xf32> -> vector<4x4xf32>
    %c0_3 = arith.constant 0 : index
    %3 = memref.load %arg2[%c0_3] : memref<1xf32, #tpu.memory_space<smem>>
    %4 = vector.broadcast %3 : f32 to vector<4x4xf32>
    %5 = arith.addf %2, %4 : vector<4x4xf32>
    %c0_4 = arith.constant 0 : index
    %c0_5 = arith.constant 0 : index
    %6 = vector.load %arg4[%c0_4, %c0_5] : memref<4x4xf32, #tpu.memory_space<vmem>>, vector<4x4xf32>
    tpu.vector_store %arg4[%c0_4, %c0_5], %5 {strides = array<i32>} : memref<4x4xf32, #tpu.memory_space<vmem>>, vector<4x4xf32>,
    return
  }
  func.func @transform_0(%arg0: i32) -> (i32, i32) {
    %c0_i32 = arith.constant 0 : i32
    %c0_i32_0 = arith.constant 0 : i32
    %c0_i32_1 = arith.constant 0 : i32
    return %c0_i32, %c0_i32_0 : i32, i32
  }
  func.func @transform_1(%arg0: i32) -> i32 {
    %c0_i32 = arith.constant 0 : i32
    %c0_i32_0 = arith.constant 0 : i32
    return %c0_i32 : i32
  }
  func.func @transform_2(%arg0: i32) -> (i32, i32) {
    %c0_i32 = arith.constant 0 : i32
    %c0_i32_0 = arith.constant 0 : i32
    return %arg0, %c0_i32 : i32, i32
  }
  func.func @transform_3(%arg0: i32) -> (i32, i32) {
    %c0_i32 = arith.constant 0 : i32
    %c0_i32_0 = arith.constant 0 : i32
    return %arg0, %c0_i32 : i32, i32
  }
}

</mosaic_0001>

<bundles_post_ra>
// kernel: tpu_custom_call.1
= control target key start
LH: loop header
LB: loop body
LE: loop exit
PB: predicated region body
PF: predicated region fallthrough
CT: control target
= control target key end

     0   :  { %v198_v1 = vmov 0.0   ;;  %vm199_vm0 = vmmov 0   ;;  %s278_s0 = inlined_call_operand.vmem [shape: f32[128,4], index: 0, kind: input, shape index: {}]   ;;  %s279_s1 = inlined_call_operand.<no memory space> [shape: f32[1], index: 1, kind: input, shape index: {}]   ;;  %s280_s2 = inlined_call_operand.vmem [shape: f32[4,128], index: 2, kind: input, shape index: {}]   ;;  %s281_s3 = inlined_call_operand.hbm [shape: f32[4,4], index: 3, kind: output, shape index: {}]  }
   0x1   :  { %v32_v0 = vld [vmem:[%s278_s0 + $0x78] sm:$0xff]  ;;  %138 = vmatprep.subr.mxu0 %v198_v1  ;;  %v31_v2 = vld [vmem:[%s278_s0 + $0x70] sm:$0xff]  ;;  %170 = vmatprep.mubr.msk.f32.mxu0 %vm199_vm0, %v198_v1  ;;  %v30_v3 = vld [vmem:[%s278_s0 + $0x68] sm:$0xff] }
   0x2   :  { %139 = vmatpush3.msra.mxu0 %v32_v0  ;;  %v29_v4 = vld [vmem:[%s278_s0 + $0x60] sm:$0xff] }
   0x3   :  { %140 = vmatprep.subr.mxu0 %v198_v1 }
   0x4   :  { %141 = vmatpush3.msra.mxu0 %v31_v2 }
   0x5   :  { %142 = vmatprep.subr.mxu0 %v198_v1 }
   0x6   :  { %9 = vsyncpa [#allocation4], 0  ;;  %143 = vmatpush3.msra.mxu0 %v30_v3  ;;  %v28_v5 = vld [vmem:[%s278_s0 + $0x58] sm:$0xff]  ;;  %v27_v6 = vld [vmem:[%s278_s0 + $0x50] sm:$0xff]  ;;  %v34_v18 = vstv %s279_s1  ;;  %s200_s21 = smov [#allocation3]   ;;  %vm105_vm1 = vcmask 27648  }
   0x7   :  { %144 = vmatprep.subr.mxu0 %v198_v1  ;;  %v26_v7 = vld [vmem:[%s278_s0 + $0x48] sm:$0xff]  ;;  %v25_v8 = vld [vmem:[%s278_s0 + $0x40] sm:$0xff]  ;;  %v24_v9 = vld [vmem:[%s278_s0 + $0x38] sm:$0xff]  ;;  %s113_s22 = sshll.u32 %s200_s21, 4  ;;  %s114_s22 = int_to_ptr.vmem [resolvable:$true] %s113_s22 }
   0x8   :  { %145 = vmatpush3.msra.mxu0 %v29_v4  ;;  %v23_v10 = vld [vmem:[%s278_s0 + $0x30] sm:$0xff]  ;;  %v22_v11 = vld [vmem:[%s278_s0 + $0x28] sm:$0xff]  ;;  %v21_v12 = vld [vmem:[%s278_s0 + $0x20] sm:$0xff]  ;;  %p181_p1 = scmp.lt.s32.totalorder %s114_s22, %s114_s22 }
   0x9   :  { %146 = vmatprep.subr.mxu0 %v198_v1  ;;  %v20_v13 = vld [vmem:[%s278_s0 + $0x18] sm:$0xff]  ;;  %v19_v14 = vld [vmem:[%s278_s0 + $0x10] sm:$0xff]  ;;  %v18_v15 = vld [vmem:[%s278_s0 + $0x8] sm:$0xff] }
   0xa   :  { %147 = vmatpush3.msra.mxu0 %v28_v5  ;;  %v17_v16 = vld [vmem:[%s278_s0] sm:$0xff]  ;;  %s176_s0 = scalar_lea.vmem %s114_s22, 64 }
   0xb   :  { %148 = vmatprep.subr.mxu0 %v198_v1  ;;  %v16_v17 = vld [vmem:[%s280_s2] sm:$0xf]  ;;  %p177_p0 = scmp.ne.s32.totalorder %s114_s22, %s176_s0  ;;  %p182_p2 = scmp.lt.s32.totalorder %s176_s0, %s176_s0 }
   0xc   :  { %149 = vmatpush3.msra.mxu0 %v27_v6 }
   0xd   :  { %150 = vmatprep.subr.mxu0 %v198_v1  ;;  %p183_p3 = por %p182_p2, %p181_p1 }
   0xe   :  { %151 = vmatpush3.msra.mxu0 %v26_v7 }
   0xf   :  { %152 = vmatprep.subr.mxu0 %v198_v1  ;;  %p184_p4 = pnand %p183_p3, %p177_p0 }
  0x10   :  { %153 = vmatpush3.msra.mxu0 %v25_v8 }
  0x11   :  { %154 = vmatprep.subr.mxu0 %v198_v1 }
  0x12   :  { %155 = vmatpush3.msra.mxu0 %v24_v9 }
  0x13   :  { %156 = vmatprep.subr.mxu0 %v198_v1 }
  0x14   :  { %157 = vmatpush3.msra.mxu0 %v23_v10 }
  0x15   :  { %158 = vmatprep.subr.mxu0 %v198_v1 }
  0x16   :  { %159 = vmatpush3.msra.mxu0 %v22_v11 }
  0x17   :  { %160 = vmatprep.subr.mxu0 %v198_v1 }
  0x18   :  { %161 = vmatpush3.msra.mxu0 %v21_v12 }
  0x19   :  { %162 = vmatprep.subr.mxu0 %v198_v1 }
  0x1a   :  { %163 = vmatpush3.msra.mxu0 %v20_v13 }
  0x1b   :  { %164 = vmatprep.subr.mxu0 %v198_v1 }
  0x1c   :  { %165 = vmatpush3.msra.mxu0 %v19_v14 }
  0x1d   :  { %166 = vmatprep.subr.mxu0 %v198_v1 }
  0x1e   :  { %167 = vmatpush3.msra.mxu0 %v18_v15 }
  0x1f   :  { %168 = vmatprep.subr.mxu0 %v198_v1 }
  0x20   :  { %169 = vmatpush3.msra.mxu0 %v17_v16 }
  0x21   :  { %171 = vmatmul.mubr.f32.vlgmr.msra.gmra.mxu0 %v16_v17 }
  0xe1   :  { %v101_v19 = vpop.f32.mrf.mxu0 }
  0xe2   :  { %v102_v20 = vadd.f32 %v101_v19, %v34_v18 }
  0xe3   :  { %v172_v21 = vpop.f32.mrf.mxu0 }
  0xe4   :  { %106 = vst.msk [vmem:[#allocation3] sm:$0xf] %vm105_vm1, %v102_v20 }
  0xe5   :  { %187 = shalt.err (!%p184_p4)
}
  0xe6   :  { %116 = dma.vmem_to_hbm [thread:$0]  %s114_s22, 64, %s281_s3, [#allocation4]  }
  0xe7   :  { %196 = dma.done.wait [#allocation4], 64  }
  0xe8   :  { %197 = vsyncadd [#allocation4], 4294967232 }
  0xe9   :  { %120 = vsyncpa [#allocation4], 1 }

</bundles_post_ra>
